<compile_context>
chip_gen: v5e
topology: v5e:2x2
jax: 0.10.0
libtpu: 0.0.40
codegen_flags: <defaults>
</compile_context>

<pallas_src>
import functools

import jax
import jax.numpy as jnp
from jax.experimental import pallas as pl
from jax.experimental.pallas import tpu as pltpu


def _maxout_kernel(x_ref, o_ref, *, out_feat: int, window: int):
    # x_ref: (tm, out_feat * window) -> o_ref: (tm, out_feat)
    x = x_ref[...]                      # one lane-dense load of the whole tile
    tm = x.shape[0]
    # Window-split of the lane axis; matches torch .view(..., F // W, W).
    # NOTE: a lane-strided load (pl.ds(..., stride=window)) would avoid this
    # reshape, but Mosaic does not support non-unit strides on the minormost
    # (lane) dim, so we keep the reshape + max reduce; the kernel is mem-bound
    # so the per-tile VPU/XLU work hides under the DMA for large tiles.
    u = x.reshape(tm, out_feat, window)
    o_ref[...] = jnp.max(u, axis=-1)


def _sublane_packing(dtype) -> int:
    # Rows per packed 32-bit sublane group: 8 (f32), 16 (bf16/f16), 32 (int8/fp8).
    itemsize = jnp.dtype(dtype).itemsize
    return max(8, 32 // max(1, itemsize))


def _choose_row_tile(rows: int, input_size: int, out_feat: int, dtype) -> int:
    """Largest packing-aligned row tile under a conservative VMEM budget."""
    itemsize = jnp.dtype(dtype).itemsize
    packing = _sublane_packing(dtype)
    # Per-block budget for (input tile + output tile).  With the default x2
    # double-buffering this stays well below the 16 MiB (v5e default scoped)
    # and 32 MiB (v6e/v7x default scoped) limits on every generation.
    budget_bytes = 4 * 1024 * 1024
    bytes_per_row = (input_size + out_feat) * itemsize
    tm = (budget_bytes // bytes_per_row) // packing * packing
    tm = max(packing, tm)
    # Keep at least two grid steps when the slab is big enough: the row axis is
    # "parallel", so >=2 steps lets Mosaic spread work across both v7x cores.
    rows_aligned = pl.cdiv(rows, packing) * packing
    if rows_aligned >= 2 * packing:
        tm = min(tm, max(packing, (rows_aligned // 2) // packing * packing))
    else:
        tm = min(tm, rows_aligned)
    return tm


def maxout(x: jax.Array, input_size: int, window_size: int) -> jax.Array:
    assert x.shape[-1] == input_size
    assert input_size % window_size == 0
    out_feat = input_size // window_size

    lead = x.shape[:-1]
    rows = 1
    for d in lead:
        rows *= d

    if rows == 0:
        # Degenerate leading dims: nothing to do.
        return jnp.zeros((*lead, out_feat), dtype=x.dtype)

    x2d = x.reshape(rows, input_size)
    itemsize = jnp.dtype(x.dtype).itemsize

    tm = _choose_row_tile(rows, input_size, out_feat, x.dtype)
    num_tiles = pl.cdiv(rows, tm)
    rows_padded = num_tiles * tm
    if rows_padded != rows:
        # Pad the tail tile; padded rows produce throwaway output rows that are
        # sliced off below (max is purely row-local, so this is exact).
        x2d = jnp.pad(x2d, ((0, rows_padded - rows), (0, 0)))

    kernel = functools.partial(_maxout_kernel, out_feat=out_feat, window=window_size)

    cost = pl.CostEstimate(
        flops=rows_padded * input_size,                       # ~1 compare / element
        transcendentals=0,
        bytes_accessed=rows_padded * (input_size + out_feat) * itemsize,
    )

    out2d = pl.pallas_call(
        kernel,
        out_shape=jax.ShapeDtypeStruct((rows_padded, out_feat), x.dtype),
        grid_spec=pltpu.PrefetchScalarGridSpec(
            num_scalar_prefetch=0,
            grid=(num_tiles,),
            in_specs=[pl.BlockSpec((tm, input_size), lambda i: (i, 0))],
            out_specs=pl.BlockSpec((tm, out_feat), lambda i: (i, 0)),
        ),
        compiler_params=pltpu.CompilerParams(
            dimension_semantics=("parallel",),
            # Raise the scoped limit above v5e's 16 MiB default; our blocks
            # (<= ~10 MiB with double-buffering) stay far below this on every
            # generation, including v7x's 64 MiB physical VMEM.
            vmem_limit_bytes=32 * 1024 * 1024,
        ),
        cost_estimate=cost,
    )(x2d)

    if rows_padded != rows:
        out2d = out2d[:rows]
    return out2d.reshape(*lead, out_feat)


def _reference_maxout(x, input_size, window_size):
    lead = x.shape[:-1]
    u = x.reshape(*lead, input_size // window_size, window_size)
    return jnp.max(u, axis=-1)


if __name__ == "__main__":
    # MaxOut has no parameters; just construct deterministic inputs.
    key = jax.random.PRNGKey(0)

    # Case 1: nominal small shape (batch=2, seq=8, hidden=32, window=4).
    input_size, window_size = 32, 4
    x = jax.random.normal(key, (2, 8, input_size), dtype=jnp.float32)
    out = jax.block_until_ready(maxout(x, input_size, window_size))
    ref = _reference_maxout(x, input_size, window_size)
    assert out.shape == (2, 8, input_size // window_size), out.shape
    assert jnp.allclose(out, ref), "float32 case: mismatch vs reference"

    # Case 2: ragged row count (231 rows, not a tile multiple) + bf16 packing,
    # exercising the cdiv + padding tail path and 16-row sublane alignment.
    input_size2, window_size2 = 64, 8
    x2 = jax.random.normal(
        jax.random.PRNGKey(0), (3, 7, 11, input_size2), dtype=jnp.bfloat16
    )
    out2 = jax.block_until_ready(maxout(x2, input_size2, window_size2))
    ref2 = _reference_maxout(x2, input_size2, window_size2)
    assert out2.shape == (3, 7, 11, input_size2 // window_size2), out2.shape
    assert jnp.array_equal(out2, ref2), "bfloat16 ragged case: mismatch vs reference"

    print("KERNEL_OK")
</pallas_src>

<mosaic_0001>
module attributes {stable_mosaic.version = 11 : i64} {
  func.func @_maxout_kernel(%arg0: i32, %arg1: memref<8x32xf32, #tpu.memory_space<vmem>>, %arg2: memref<8x8xf32, #tpu.memory_space<vmem>>) attributes {dimension_semantics = [#tpu.dimension_semantics<parallel>], iteration_bounds = array<i64: 2>, scalar_prefetch = 0 : i64, scratch_operands = 0 : i64, tpu.core_type = #tpu.core_type<tc>, window_params = [{transform_indices = @transform_0, window_bounds = array<i64: 8, 32>}, {transform_indices = @transform_1, window_bounds = array<i64: 8, 8>}]} {
    %c0 = arith.constant 0 : index
    %c0_0 = arith.constant 0 : index
    %0 = vector.load %arg1[%c0, %c0_0] : memref<8x32xf32, #tpu.memory_space<vmem>>, vector<8x32xf32>
    %1 = vector.shape_cast %0 : vector<8x32xf32> to vector<8x8x4xf32>
    %cst = arith.constant dense<0xFF800000> : vector<8x8xf32>
    %2 = vector.multi_reduction <maximumf>, %1, %cst [2] : vector<8x8x4xf32> to vector<8x8xf32>
    %c0_1 = arith.constant 0 : index
    %c0_2 = arith.constant 0 : index
    %3 = vector.load %arg2[%c0_1, %c0_2] : memref<8x8xf32, #tpu.memory_space<vmem>>, vector<8x8xf32>
    tpu.vector_store %arg2[%c0_1, %c0_2], %2 {strides = array<i32>} : memref<8x8xf32, #tpu.memory_space<vmem>>, vector<8x8xf32>,
    return
  }
  func.func @transform_0(%arg0: i32) -> (i32, i32) {
    %c0_i32 = arith.constant 0 : i32
    %c0_i32_0 = arith.constant 0 : i32
    return %arg0, %c0_i32 : i32, i32
  }
  func.func @transform_1(%arg0: i32) -> (i32, i32) {
    %c0_i32 = arith.constant 0 : i32
    %c0_i32_0 = arith.constant 0 : i32
    return %arg0, %c0_i32 : i32, i32
  }
}

</mosaic_0001>

<bundles_post_ra>
// kernel: tpu_custom_call.1
= control target key start
LH: loop header
LB: loop body
LE: loop exit
PB: predicated region body
PF: predicated region fallthrough
CT: control target
= control target key end

     0   :  { %6 = vsyncpa [#allocation3], 0  ;;  %s664_s0 = inlined_call_operand.hbm [shape: f32[16,32], index: 0, kind: input, shape index: {}]   ;;  %s665_s1 = inlined_call_operand.vmem [shape: f32[16,8], index: 1, kind: output, shape index: {}]  }
   0x1   :  { %8 = vsyncpa [#allocation3 + $0x1], 0  ;;  %s538_s6 = smov 0   ;;  %s540_s7 = smov 0  }
   0x2   :  { %s542_s8 = smov 0   ;;  %s544_s9 = smov 0  }
   0x3 LB: > { %s557_s10 = sadd.s32 4294967295, %s517_s9   ;;  %s560_s11 = sadd.s32 1, %s517_s9   ;;  %s517_s9 = sphi %s544_s9, %s672_s9   ;;  %s513_s8 = sphi %s542_s8, %s671_s8   ;;  %s509_s7 = sphi %s540_s7, %s670_s7   ;;  %s505_s6 = sphi %s538_s6, %s669_s6  }
   0x4   : > { %s18_s12 = ssub.s32 %s517_s9, %s560_s11  ;;  %s21_s13 = sadd.s32 1, %s513_s8 }
   0x5   : > { %p19_p0 = scmp.eq.s32.totalorder %s18_s12, 0  ;;  %p28_p1 = scmp.ne.s32.totalorder %s513_s8, %s509_s7 }
   0x6   : > { %p29_p2 = scmp.eq.s32.totalorder %s517_s9, 0  ;;  %p34_p3 = scmp.ne.s32.totalorder %s509_s7, %s505_s6 }
   0x7   : > { %s570_s14 = scalar_select %p19_p0, %s513_s8, %s21_s13  }
   0x8   : > { %p572_p4 = por %p29_p2, %p28_p1  ;;  %p35_p5 = scmp.eq.s32.totalorder %s557_s10, 0 }
   0x9   : > { %p411_p6 = scmp.lt.s32.totalorder %s517_s9, 2  ;;  %s84_s17 = sand.u32 1, %s513_s8  }
   0xa   : > { %p578_p7 = por %p35_p5, %p34_p3  ;;  %s398_s18 = sshll.u32 %s84_s17, 3 }
   0xb   : > { %s399_s19 = sshll.u32 %s517_s9, 3  ;;  %s88_s23 = scalar_lea.vmem [#allocation2], %s398_s18 }
   0xc   : > { %s92_s22 = scalar_lea.hbm %s664_s0, %s399_s19  ;;  %s96_s24 = sshll.u32 %s88_s23, 4  ;;  %s97_s24 = int_to_ptr.vmem [resolvable:$true] %s96_s24 }
   0xd   : > { %s94_s25 = sshll.u32 %s92_s22, 4  ;;  %p589_p8 = pnand %p411_p6, %p572_p4  ;;  %s95_s25 = int_to_ptr.hbm [resolvable:$true] %s94_s25 }
   0xe   : > { %p400_p9 = scmp.ge.s32.totalorder %s517_s9, 1  ;;  %p101_p10 = scmp.lt.s32.totalorder %s517_s9, 3 }
   0xf   : > { %s85_s27 = scalar_lea.sflag [#allocation3], %s84_s17  ;;  %s453_s28 = sshra.s32 %s95_s25, 4  ;;  %s454_s28 = int_to_ptr.hbm [resolvable:$true] %s453_s28 }
  0x10   : > { %s455_s29 = scalar_lea.hbm %s454_s28, 8  ;;  %p457_p12 = pneg %p589_p8 }
  0x11   : > { %p456_p11 = scmp.ne.s32.totalorder %s454_s28, %s455_s29  ;;  %s460_s3 = scalar_lea.hbm %s664_s0, 16 }
  0x12   : > { %p461_p1 = scmp.lt.s32.totalorder %s454_s28, %s664_s0  ;;  %p462_p2 = scmp.lt.s32.totalorder %s460_s3, %s455_s29 }
  0x13   : > { %p458_p13 = pnand %p457_p12, %p456_p11 }
  0x14   : > { %p463_p3 = por %p462_p2, %p461_p1 }
  0x15   : > { %p459_p0 = pneg %p458_p13 }
  0x17   : > { %p464_p4 = pnand %p463_p3, %p459_p0 }
  0x19   : > { %467 = shalt.err (!%p464_p4)
}
  0x1a   : > { %410 = dma.hbm_to_vmem [thread:$0]  (!%p589_p8), %s95_s25, 128, %s97_s24, %s85_s27  }
  0x1b   : > { %p102_p5 = pnand %p400_p9, %p101_p10 }
  0x1c   : > { %s107_s6 = sand.u32 (!%p102_p5), 1, %s509_s7  }
  0x1d   : > { %105 = sbr.rel (%p102_p5) target bundleno = 313 (0x139), region = 24  ;;  %s401_s12 = sshll.u32 (!%p102_p5), %s107_s6, 3 }
  0x1e   : > { %s108_s13 = scalar_lea.sflag (!%p102_p5), [#allocation3], %s107_s6  ;;  %s111_s15 = scalar_lea.vmem (!%p102_p5), [#allocation2], %s401_s12 }
  0x22   : > { %500 = dma.done.wait (%p578_p7), %s108_s13, 128  }
  0x23   : > { %502 = vsyncadd (%p578_p7), %s108_s13, 4294967168  ;;  %v134_v0 = vld [vmem:[%s111_s15] sm:$0xff]  ;;  %s519_s17 = smov 104   ;;  %s520_s18 = smov 116   ;;  %v526_v4 = vmov 1983009808  }
  0x24   : > { %151 = vrot.lane.b32.xlu1 %v134_v0, %s519_s17  ;;  %142 = vrot.lane.b32.xlu0 %v134_v0, %s520_s18  ;;  %s521_s19 = smov 120   ;;  %s522_s9 = smov 124   ;;  %v163_v5 = vunpack.c.l.s4 %v526_v4  ;;  %vm158_vm0 = vcmask 1047556   ;;  %v527_v20 = vmov 1934713408   ;;  %v160_v22 = vrot.slane %v134_v0, 4 }
  0x25   : > { %139 = vrot.lane.b32.xlu2 %v134_v0, %s521_s19  ;;  %s523_s20 = smov 100   ;;  %s524_s21 = smov 108   ;;  %v211_v21 = vunpack.c.l.s4 %v527_v20  ;;  %vm270_vm1 = vcmask 31744   ;;  %vm313_vm2 = vcmask 1041409   ;;  %vm315_vm3 = vcmask 1042434  }
  0x26   : > { %s525_s22 = smov 112   ;;  %v164_v8 = vunpack.c.0.s8 %v163_v5  ;;  %p130_p6 = scmp.lt.s32.totalorder %s557_s10, 1  ;;  %vm317_vm4 = vcmask 1043459   ;;  %vm319_vm5 = vcmask 1044484   ;;  %vm321_vm6 = vcmask 1045509  }
  0x27   : > { %v212_v30 = vunpack.c.0.s8 %v211_v21  ;;  %vm323_vm7 = vcmask 1046534   ;;  %vm325_vm8 = vcmask 1047559   ;;  %vm328_vm9 = vcmask 64512  }
  0x28   : > { %s674_s10 = smov (!%p130_p6, %s557_s10), 1 }
  0x29   : > { %s402_s16 = sshll.u32 %s674_s10, 3 }
  0x2a   : > { %s133_s25 = scalar_lea.vmem %s665_s1, %s402_s16 }
  0x2c   : > { %136 = vrot.lane.b32.xlu1 %v134_v0, %s522_s9  ;;  %154 = vrot.lane.b32.xlu0 %v134_v0, %s523_s20 }
  0x2d   : > { %148 = vrot.lane.b32.xlu2 %v134_v0, %s524_s21 }
  0x34   : > { %145 = vrot.lane.b32.xlu0 %v134_v0, %s525_s22 }
  0x7f   : > { %v140_v1 = vpop.permute.xlu2 %139 }
  0x80   : > { %v157_v6 = vrot.slane %v140_v1, 4  ;;  %v161_v31 = vsel %vm158_vm0, %v140_v1, %v160_v22 }
  0x81   : > { %v169_v40 = vperm.slane %v161_v31, %v164_v8 }
  0x82   : > { %v159_v10 = vsel %vm158_vm0, %v157_v6, %v134_v0 }
  0x83   : > { %v165_v18 = vperm.slane %v159_v10, %v164_v8  ;;  %v220_v62 = vrot.slane %v169_v40, 4 }
  0x85   : > { %v208_v28 = vrot.slane %v165_v18, 4 }
  0x87   : > { %v149_v7 = vpop.permute.xlu2 %148 }
  0x88   : > { %v196_v13 = vrot.slane %v149_v7, 4 }
  0x96   : > { %v152_v2 = vpop.permute.xlu1 %151  ;;  %v143_v3 = vpop.permute.xlu0 %142 }
  0x97   : > { %v170_v9 = vrot.slane %v143_v3, 4  ;;  %v182_v29 = vrot.slane %v152_v2, 4 }
  0x9e   : > { %v137_v11 = vpop.permute.xlu1 %136  ;;  %v155_v12 = vpop.permute.xlu0 %154 }
  0x9f   : > { %v171_v14 = vsel %vm158_vm0, %v170_v9, %v137_v11  ;;  %v194_v15 = vrot.slane %v155_v12, 4  ;;  %v172_v16 = vrot.slane %v137_v11, 4  ;;  %v197_v24 = vsel %vm158_vm0, %v155_v12, %v196_v13 }
  0xa0   : > { %v177_v17 = vperm.slane %v171_v14, %v164_v8  ;;  %v205_v32 = vperm.slane %v197_v24, %v164_v8 }
  0xa1   : > { %v195_v19 = vsel %vm158_vm0, %v194_v15, %v149_v7  ;;  %v173_v25 = vsel %vm158_vm0, %v143_v3, %v172_v16 }
  0xa2   : > { %v206_v23 = vrot.slane %v177_v17, 4  ;;  %v201_v26 = vperm.slane %v195_v19, %v164_v8  ;;  %v181_v34 = vperm.slane %v173_v25, %v164_v8  ;;  %v209_v42 = vsel %vm158_vm0, %v177_v17, %v208_v28 }
  0xa3   : > { %v242_v43 = vrot.slane %v205_v32, 4  ;;  %v217_v51 = vperm.slane %v209_v42, %v212_v30 }
  0xa4   : > { %v207_v27 = vsel %vm158_vm0, %v206_v23, %v165_v18  ;;  %v230_v38 = vrot.slane %v201_v26, 4  ;;  %v218_v47 = vrot.slane %v181_v34, 4  ;;  %v221_v6 = vsel %vm158_vm0, %v181_v34, %v220_v62 }
  0xa5   : > { %v213_v37 = vperm.slane %v207_v27, %v212_v30  ;;  %v260_v3 = vrot.slane %v217_v51, 4  ;;  %v229_v11 = vperm.slane %v221_v6, %v212_v30  ;;  %v303_v23 = vlaneseq }
  0xa6   : > { %v146_v33 = vpop.permute.xlu0 %145  ;;  %v219_v0 = vsel %vm158_vm0, %v218_v47, %v169_v40 }
  0xa7   : > { %v183_v35 = vsel %vm158_vm0, %v182_v29, %v146_v33  ;;  %v184_v36 = vrot.slane %v146_v33, 4  ;;  %v256_v49 = vrot.slane %v213_v37, 4  ;;  %v268_v18 = vrot.slane %v229_v11, 4 }
  0xa8   : > { %v189_v39 = vperm.slane %v183_v35, %v164_v8  ;;  %v304_v25 = vand.u32 127, %v303_v23 }
  0xa9   : > { %v185_v41 = vsel %vm158_vm0, %v152_v2, %v184_v36 }
  0xaa   : > { %v193_v44 = vperm.slane %v185_v41, %v164_v8  ;;  %v232_v45 = vrot.slane %v189_v39, 4  ;;  %v231_v46 = vsel %vm158_vm0, %v230_v38, %v189_v39  ;;  %v225_v8 = vperm.slane %v219_v0, %v212_v30 }
  0xab   : > { %v237_v48 = vperm.slane %v231_v46, %v212_v30 }
  0xac   : > { %v244_v50 = vrot.slane %v193_v44, 4  ;;  %v233_v52 = vsel %vm158_vm0, %v201_v26, %v232_v45  ;;  %v243_v53 = vsel %vm158_vm0, %v242_v43, %v193_v44  ;;  %v264_v15 = vrot.slane %v225_v8, 4 }
  0xad   : > { %v257_v54 = vsel %vm158_vm0, %v237_v48, %v256_v49  ;;  %v254_v55 = vrot.slane %v237_v48, 4  ;;  %v241_v56 = vperm.slane %v233_v52, %v212_v30  ;;  %v249_v57 = vperm.slane %v243_v53, %v212_v30 }
  0xae   : > { %v274_v58 = vsel %vm270_vm1, %v257_v54, -inf  ;;  %v245_v59 = vsel %vm158_vm0, %v205_v32, %v244_v50 }
  0xaf   : > { %275 = vmax.xlane.f32.xlu2 %v274_v58  ;;  %v255_v60 = vsel %vm158_vm0, %v254_v55, %v213_v37  ;;  %v258_v61 = vrot.slane %v241_v56, 4  ;;  %v253_v1 = vperm.slane %v245_v59, %v212_v30  ;;  %v262_v4 = vrot.slane %v249_v57, 4 }
  0xb0   : > { %v271_v63 = vsel %vm270_vm1, %v255_v60, -inf  ;;  %v261_v7 = vsel %vm158_vm0, %v241_v56, %v260_v3  ;;  %v265_v17 = vsel %vm158_vm0, %v249_v57, %v264_v15 }
  0xb1   : > { %272 = vmax.xlane.f32.xlu1 %v271_v63  ;;  %v259_v2 = vsel %vm158_vm0, %v258_v61, %v217_v51  ;;  %v266_v9 = vrot.slane %v253_v1, 4  ;;  %v263_v10 = vsel %vm158_vm0, %v262_v4, %v225_v8  ;;  %v280_v12 = vsel %vm270_vm1, %v261_v7, -inf }
  0xb2   : > { %v277_v5 = vsel %vm270_vm1, %v259_v2, -inf  ;;  %v283_v14 = vsel %vm270_vm1, %v263_v10, -inf  ;;  %v269_v19 = vsel %vm158_vm0, %v253_v1, %v268_v18  ;;  %v286_v20 = vsel %vm270_vm1, %v265_v17, -inf }
  0xb3   : > { %278 = vmax.xlane.f32.xlu0 %v277_v5  ;;  %v267_v13 = vsel %vm158_vm0, %v266_v9, %v229_v11  ;;  %v292_v21 = vsel %vm270_vm1, %v269_v19, -inf }
  0xb4   : > { %v289_v16 = vsel %vm270_vm1, %v267_v13, -inf }
  0xb7   : > { %281 = vmax.xlane.f32.xlu2 %v280_v12 }
  0xb9   : > { %284 = vmax.xlane.f32.xlu1 %v283_v14 }
  0xbb   : > { %290 = vmax.xlane.f32.xlu0 %v289_v16 }
  0xbf   : > { %287 = vmax.xlane.f32.xlu2 %v286_v20 }
  0xc1   : > { %293 = vmax.xlane.f32.xlu1 %v292_v21 }
 0x122   : > { %v276_v22 = vpop.xlane.xlu2 %275 }
 0x123   : > { %v306_v29 = vperm.slane %v276_v22, %v304_v25 }
 0x124   : > { %v273_v24 = vpop.xlane.xlu1 %272 }
 0x125   : > { %v305_v27 = vperm.slane %v273_v24, %v304_v25 }
 0x126   : > { %v279_v26 = vpop.xlane.xlu0 %278 }
 0x127   : > { %v307_v30 = vperm.slane %v279_v26, %v304_v25  ;;  %v314_v32 = vsel %vm313_vm2, %v306_v29, %v305_v27 }
 0x129   : > { %v316_v34 = vsel %vm315_vm3, %v307_v30, %v314_v32 }
 0x12a   : > { %v282_v28 = vpop.xlane.xlu2 %281 }
 0x12b   : > { %v308_v33 = vperm.slane %v282_v28, %v304_v25 }
 0x12c   : > { %v285_v31 = vpop.xlane.xlu1 %284 }
 0x12d   : > { %v309_v35 = vperm.slane %v285_v31, %v304_v25  ;;  %v318_v36 = vsel %vm317_vm4, %v308_v33, %v316_v34 }
 0x12e   : > { %v291_v37 = vpop.xlane.xlu0 %290 }
 0x12f   : > { %v320_v40 = vsel %vm319_vm5, %v309_v35, %v318_v36  ;;  %v311_v41 = vperm.slane %v291_v37, %v304_v25 }
 0x132   : > { %v288_v38 = vpop.xlane.xlu2 %287 }
 0x133   : > { %v310_v39 = vperm.slane %v288_v38, %v304_v25 }
 0x134   : > { %v294_v42 = vpop.xlane.xlu1 %293 }
 0x135   : > { %v322_v43 = vsel %vm321_vm6, %v310_v39, %v320_v40  ;;  %v312_v44 = vperm.slane %v294_v42, %v304_v25 }
 0x136   : > { %v324_v45 = vsel %vm323_vm7, %v311_v41, %v322_v43 }
 0x137   : > { %v326_v46 = vsel %vm325_vm8, %v312_v44, %v324_v45 }
 0x138   : > { %329 = vst.msk [vmem:[%s133_s25] sm:$0xff] %vm328_vm9, %v326_v46 }
 0x139 PF: > { %p11_p7 = scmp.ge.s32.totalorder %s560_s11, 4   ;;  %s669_s6 = smov %s509_s7 }
 0x13a   : > { %s670_s7 = smov %s513_s8  ;;  %s671_s8 = smov %s570_s14 }
 0x13b   : > { %s672_s9 = smov %s560_s11  ;;  %13 = sbr.rel (!%p11_p7) target bundleno = 3 (0x3), region = 64 }
 0x140   :  { %349 = vsyncpa [#allocation3], 1 }
 0x141   :  { %351 = vsyncpa [#allocation3 + $0x1], 1 }

</bundles_post_ra>
